<compile_context>
chip_gen: v5e
topology: v5e:2x2
jax: 0.10.0
libtpu: 0.0.40
codegen_flags: <defaults>
</compile_context>

<pallas_src>
import functools

import jax
import jax.numpy as jnp
from jax import lax
from jax.experimental import pallas as pl
from jax.experimental.pallas import tpu as pltpu

# Small, module-consistent hyperparameters (PyTorch module uses n_embd=768,
# n_head=12, block_size=1024; shrunk for a quick synthetic run).
N_EMBD = 32
N_HEAD = 4
HEAD_SIZE = 8   # n_embd // n_head
SEQ = 16        # T <= block_size
BATCH = 2


def _mha_fused_kernel(x_ref, wqkv_ref, wproj_ref, bproj_ref, o_ref,
                      *, n_head, head_size):
    """One batch element: QKV proj + per-head causal attention + out proj."""
    x = x_ref[0].astype(jnp.float32)               # (T, C)
    wqkv = wqkv_ref[...].astype(jnp.float32)       # (C, 3*H*hs)
    wproj = wproj_ref[...].astype(jnp.float32)     # (H*hs, C)
    bias = bproj_ref[...].astype(jnp.float32)      # (1, C)

    T, C = x.shape
    hh = n_head * head_size                        # H*hs
    scale = C ** (-0.5)                            # matches PyTorch: uses n_embd
    neg_large = -1e30                              # Python literal (not captured)

    # Single wide projection: (T, C) @ (C, 3*H*hs)
    qkv = jnp.dot(x, wqkv, preferred_element_type=jnp.float32)

    # Causal mask computed once per kernel invocation.
    row = lax.broadcasted_iota(jnp.int32, (T, T), 0)
    col = lax.broadcasted_iota(jnp.int32, (T, T), 1)
    causal = col <= row

    head_outs = []
    for h in range(n_head):                        # short, fully unrolled
        lo = h * head_size
        q_h = qkv[:, lo:lo + head_size]                       # (T, hs)
        k_h = qkv[:, hh + lo:hh + lo + head_size]             # (T, hs)
        v_h = qkv[:, 2 * hh + lo:2 * hh + lo + head_size]     # (T, hs)

        # q @ k^T without materializing a transpose: contract hs axes.
        s = lax.dot_general(
            q_h, k_h, dimension_numbers=(((1,), (1,)), ((), ())),
            preferred_element_type=jnp.float32) * scale        # (T, T)
        s = jnp.where(causal, s, neg_large)

        # Numerically-stable softmax; normalize with EUP reciprocal.
        m = jnp.max(s, axis=-1, keepdims=True)
        e = jnp.exp(s - m)
        denom = jnp.sum(e, axis=-1, keepdims=True)
        p = e * pl.reciprocal(denom, approx=True)

        head_outs.append(
            jnp.dot(p, v_h, preferred_element_type=jnp.float32))  # (T, hs)

    y = jnp.concatenate(head_outs, axis=-1)                       # (T, H*hs)
    out = jnp.dot(y, wproj, preferred_element_type=jnp.float32) + bias
    o_ref[0] = out.astype(o_ref.dtype)                            # lane-dense (T, C)


def multi_head_attention(x, wq, wk, wv, wproj_t, bproj):
    B, T, C = x.shape
    H, _, hs = wq.shape
    hh = H * hs

    # Pack per-head weights once into a single (C, 3*H*hs) QKV weight.
    # Column layout: [q_head0..q_headH | k_head0..k_headH | v_head0..v_headH].
    wq_cols = jnp.transpose(wq, (1, 0, 2)).reshape(C, hh)
    wk_cols = jnp.transpose(wk, (1, 0, 2)).reshape(C, hh)
    wv_cols = jnp.transpose(wv, (1, 0, 2)).reshape(C, hh)
    wqkv = jnp.concatenate([wq_cols, wk_cols, wv_cols], axis=-1)   # (C, 3*H*hs)

    kernel = functools.partial(_mha_fused_kernel, n_head=H, head_size=hs)

    return pl.pallas_call(
        kernel,
        out_shape=jax.ShapeDtypeStruct((B, T, C), x.dtype),
        grid=(B,),
        in_specs=[
            pl.BlockSpec((1, T, C), lambda b: (b, 0, 0)),       # x: per-batch tile
            pl.BlockSpec((C, 3 * hh), lambda b: (0, 0)),        # wqkv: VMEM-resident
            pl.BlockSpec((hh, C), lambda b: (0, 0)),            # wproj: VMEM-resident
            pl.BlockSpec((1, C), lambda b: (0, 0)),             # bias:  VMEM-resident
        ],
        out_specs=pl.BlockSpec((1, T, C), lambda b: (b, 0, 0)),  # lane-dense output
        compiler_params=pltpu.CompilerParams(
            dimension_semantics=("parallel",)),
    )(x, wqkv, wproj_t, bproj.reshape(1, C))


def _reference(x, wq, wk, wv, wproj_t, bproj):
    """Pure-JAX reference mirroring the PyTorch forward exactly."""
    B, T, C = x.shape
    outs = []
    for h in range(wq.shape[0]):
        q = x @ wq[h]
        k = x @ wk[h]
        v = x @ wv[h]
        wei = (q @ jnp.swapaxes(k, -2, -1)) * (C ** (-0.5))
        mask = jnp.tril(jnp.ones((T, T), dtype=bool))
        wei = jnp.where(mask, wei, -jnp.inf)
        wei = jax.nn.softmax(wei, axis=-1)
        outs.append(wei @ v)
    cat = jnp.concatenate(outs, axis=-1)
    return cat @ wproj_t + bproj


if __name__ == "__main__":
    key = jax.random.PRNGKey(0)
    kx, kq, kk, kv, kp, kb = jax.random.split(key, 6)

    x = jax.random.normal(kx, (BATCH, SEQ, N_EMBD), dtype=jnp.float32)

    # Deterministic synthetic parameters (PyTorch Linear shapes, pre-transposed).
    scale = 1.0 / (N_EMBD ** 0.5)
    wq = jax.random.normal(kq, (N_HEAD, N_EMBD, HEAD_SIZE), dtype=jnp.float32) * scale
    wk = jax.random.normal(kk, (N_HEAD, N_EMBD, HEAD_SIZE), dtype=jnp.float32) * scale
    wv = jax.random.normal(kv, (N_HEAD, N_EMBD, HEAD_SIZE), dtype=jnp.float32) * scale
    wproj_t = jax.random.normal(kp, (N_HEAD * HEAD_SIZE, N_EMBD), dtype=jnp.float32) * scale
    bproj = jax.random.normal(kb, (N_EMBD,), dtype=jnp.float32) * 0.1

    out = multi_head_attention(x, wq, wk, wv, wproj_t, bproj)
    out = jax.block_until_ready(out)

    ref = _reference(x, wq, wk, wv, wproj_t, bproj)
    assert out.shape == (BATCH, SEQ, N_EMBD)
    # Tolerance loosened slightly for the approx-reciprocal softmax normalize.
    assert jnp.allclose(out, ref, atol=5e-3, rtol=5e-3), (
        float(jnp.max(jnp.abs(out - ref))))

    print("KERNEL_OK")
</pallas_src>

<mosaic_0001>
module attributes {stable_mosaic.version = 11 : i64} {
  func.func @_mha_fused_kernel(%arg0: i32, %arg1: memref<1x16x32xf32, #tpu.memory_space<vmem>>, %arg2: memref<32x96xf32, #tpu.memory_space<vmem>>, %arg3: memref<32x32xf32, #tpu.memory_space<vmem>>, %arg4: memref<1x32xf32, #tpu.memory_space<vmem>>, %arg5: memref<1x16x32xf32, #tpu.memory_space<vmem>>) attributes {dimension_semantics = [#tpu.dimension_semantics<parallel>], iteration_bounds = array<i64: 2>, scalar_prefetch = 0 : i64, scratch_operands = 0 : i64, tpu.core_type = #tpu.core_type<tc>, window_params = [{transform_indices = @transform_0, window_bounds = array<i64: 1, 16, 32>}, {pipeline_mode = #tpu.pipeline_mode<synchronous>, transform_indices = @transform_1, window_bounds = array<i64: 32, 96>}, {pipeline_mode = #tpu.pipeline_mode<synchronous>, transform_indices = @transform_2, window_bounds = array<i64: 32, 32>}, {pipeline_mode = #tpu.pipeline_mode<synchronous>, transform_indices = @transform_3, window_bounds = array<i64: 1, 32>}, {transform_indices = @transform_4, window_bounds = array<i64: 1, 16, 32>}]} {
    %c0 = arith.constant 0 : index
    %c0_0 = arith.constant 0 : index
    %c0_1 = arith.constant 0 : index
    %0 = vector.load %arg1[%c0, %c0_0, %c0_1] : memref<1x16x32xf32, #tpu.memory_space<vmem>>, vector<1x16x32xf32>
    %1 = vector.shape_cast %0 : vector<1x16x32xf32> to vector<16x32xf32>
    %c0_2 = arith.constant 0 : index
    %c0_3 = arith.constant 0 : index
    %2 = vector.load %arg2[%c0_2, %c0_3] : memref<32x96xf32, #tpu.memory_space<vmem>>, vector<32x96xf32>
    %c0_4 = arith.constant 0 : index
    %c0_5 = arith.constant 0 : index
    %3 = vector.load %arg3[%c0_4, %c0_5] : memref<32x32xf32, #tpu.memory_space<vmem>>, vector<32x32xf32>
    %c0_6 = arith.constant 0 : index
    %c0_7 = arith.constant 0 : index
    %4 = vector.load %arg4[%c0_6, %c0_7] : memref<1x32xf32, #tpu.memory_space<vmem>>, vector<1x32xf32>
    %cst = arith.constant dense<0.000000e+00> : vector<16x96xf32>
    %5 = tpu.matmul %1, %2, %cst {dimension_numbers = #tpu.dot_dimension_numbers<[1], [0], [0], [1], [0, 0, 1, 1], [], []>} : vector<16x32xf32>, vector<32x96xf32>, vector<16x96xf32> -> vector<16x96xf32>
    %6 = tpu.iota {dimensions = array<i32: 0>} : vector<16x16xi32>
    %7 = tpu.iota {dimensions = array<i32: 1>} : vector<16x16xi32>
    %8 = arith.cmpi sle, %7, %6 : vector<16x16xi32>
    %9 = vector.extract_strided_slice %5 {offsets = [0, 0], sizes = [16, 8], strides = [1, 1]} : vector<16x96xf32> to vector<16x8xf32>
    %10 = vector.extract_strided_slice %5 {offsets = [0, 32], sizes = [16, 8], strides = [1, 1]} : vector<16x96xf32> to vector<16x8xf32>
    %11 = vector.extract_strided_slice %5 {offsets = [0, 64], sizes = [16, 8], strides = [1, 1]} : vector<16x96xf32> to vector<16x8xf32>
    %cst_8 = arith.constant dense<0.000000e+00> : vector<16x16xf32>
    %12 = tpu.matmul %9, %10, %cst_8 {dimension_numbers = #tpu.dot_dimension_numbers<[1], [1], [0], [0], [0, 0, 1, 0], [], []>} : vector<16x8xf32>, vector<16x8xf32>, vector<16x16xf32> -> vector<16x16xf32>
    %cst_9 = arith.constant 0.176776692 : f32
    %13 = vector.broadcast %cst_9 : f32 to vector<16x16xf32>
    %14 = arith.mulf %12, %13 : vector<16x16xf32>
    %cst_10 = arith.constant -1.000000e+30 : f32
    %15 = vector.broadcast %cst_10 : f32 to vector<16x16xf32>
    %16 = arith.select %8, %14, %15 : vector<16x16xi1>, vector<16x16xf32>
    %cst_11 = arith.constant dense<0xFF800000> : vector<16xf32>
    %17 = vector.multi_reduction <maximumf>, %16, %cst_11 [1] : vector<16x16xf32> to vector<16xf32>
    %18 = vector.shape_cast %17 : vector<16xf32> to vector<16x1xf32>
    %19 = vector.broadcast %18 : vector<16x1xf32> to vector<16x16xf32>
    %20 = arith.subf %16, %19 : vector<16x16xf32>
    %21 = math.exp %20 : vector<16x16xf32>
    %cst_12 = arith.constant dense<0.000000e+00> : vector<16xf32>
    %22 = vector.multi_reduction <add>, %21, %cst_12 [1] : vector<16x16xf32> to vector<16xf32>
    %23 = vector.shape_cast %22 : vector<16xf32> to vector<16x1xf32>
    %24 = tpu.reciprocal %23 {approx = true} : vector<16x1xf32> -> vector<16x1xf32>
    %25 = vector.broadcast %24 : vector<16x1xf32> to vector<16x16xf32>
    %26 = arith.mulf %21, %25 : vector<16x16xf32>
    %cst_13 = arith.constant dense<0.000000e+00> : vector<16x8xf32>
    %27 = tpu.matmul %26, %11, %cst_13 {dimension_numbers = #tpu.dot_dimension_numbers<[1], [0], [0], [1], [0, 0, 1, 1], [], []>} : vector<16x16xf32>, vector<16x8xf32>, vector<16x8xf32> -> vector<16x8xf32>
    %28 = vector.extract_strided_slice %5 {offsets = [0, 8], sizes = [16, 8], strides = [1, 1]} : vector<16x96xf32> to vector<16x8xf32>
    %29 = vector.extract_strided_slice %5 {offsets = [0, 40], sizes = [16, 8], strides = [1, 1]} : vector<16x96xf32> to vector<16x8xf32>
    %30 = vector.extract_strided_slice %5 {offsets = [0, 72], sizes = [16, 8], strides = [1, 1]} : vector<16x96xf32> to vector<16x8xf32>
    %cst_14 = arith.constant dense<0.000000e+00> : vector<16x16xf32>
    %31 = tpu.matmul %28, %29, %cst_14 {dimension_numbers = #tpu.dot_dimension_numbers<[1], [1], [0], [0], [0, 0, 1, 0], [], []>} : vector<16x8xf32>, vector<16x8xf32>, vector<16x16xf32> -> vector<16x16xf32>
    %cst_15 = arith.constant 0.176776692 : f32
    %32 = vector.broadcast %cst_15 : f32 to vector<16x16xf32>
    %33 = arith.mulf %31, %32 : vector<16x16xf32>
    %cst_16 = arith.constant -1.000000e+30 : f32
    %34 = vector.broadcast %cst_16 : f32 to vector<16x16xf32>
    %35 = arith.select %8, %33, %34 : vector<16x16xi1>, vector<16x16xf32>
    %cst_17 = arith.constant dense<0xFF800000> : vector<16xf32>
    %36 = vector.multi_reduction <maximumf>, %35, %cst_17 [1] : vector<16x16xf32> to vector<16xf32>
    %37 = vector.shape_cast %36 : vector<16xf32> to vector<16x1xf32>
    %38 = vector.broadcast %37 : vector<16x1xf32> to vector<16x16xf32>
    %39 = arith.subf %35, %38 : vector<16x16xf32>
    %40 = math.exp %39 : vector<16x16xf32>
    %cst_18 = arith.constant dense<0.000000e+00> : vector<16xf32>
    %41 = vector.multi_reduction <add>, %40, %cst_18 [1] : vector<16x16xf32> to vector<16xf32>
    %42 = vector.shape_cast %41 : vector<16xf32> to vector<16x1xf32>
    %43 = tpu.reciprocal %42 {approx = true} : vector<16x1xf32> -> vector<16x1xf32>
    %44 = vector.broadcast %43 : vector<16x1xf32> to vector<16x16xf32>
    %45 = arith.mulf %40, %44 : vector<16x16xf32>
    %cst_19 = arith.constant dense<0.000000e+00> : vector<16x8xf32>
    %46 = tpu.matmul %45, %30, %cst_19 {dimension_numbers = #tpu.dot_dimension_numbers<[1], [0], [0], [1], [0, 0, 1, 1], [], []>} : vector<16x16xf32>, vector<16x8xf32>, vector<16x8xf32> -> vector<16x8xf32>
    %47 = vector.extract_strided_slice %5 {offsets = [0, 16], sizes = [16, 8], strides = [1, 1]} : vector<16x96xf32> to vector<16x8xf32>
    %48 = vector.extract_strided_slice %5 {offsets = [0, 48], sizes = [16, 8], strides = [1, 1]} : vector<16x96xf32> to vector<16x8xf32>
    %49 = vector.extract_strided_slice %5 {offsets = [0, 80], sizes = [16, 8], strides = [1, 1]} : vector<16x96xf32> to vector<16x8xf32>
    %cst_20 = arith.constant dense<0.000000e+00> : vector<16x16xf32>
    %50 = tpu.matmul %47, %48, %cst_20 {dimension_numbers = #tpu.dot_dimension_numbers<[1], [1], [0], [0], [0, 0, 1, 0], [], []>} : vector<16x8xf32>, vector<16x8xf32>, vector<16x16xf32> -> vector<16x16xf32>
    %cst_21 = arith.constant 0.176776692 : f32
    %51 = vector.broadcast %cst_21 : f32 to vector<16x16xf32>
    %52 = arith.mulf %50, %51 : vector<16x16xf32>
    %cst_22 = arith.constant -1.000000e+30 : f32
    %53 = vector.broadcast %cst_22 : f32 to vector<16x16xf32>
    %54 = arith.select %8, %52, %53 : vector<16x16xi1>, vector<16x16xf32>
    %cst_23 = arith.constant dense<0xFF800000> : vector<16xf32>
    %55 = vector.multi_reduction <maximumf>, %54, %cst_23 [1] : vector<16x16xf32> to vector<16xf32>
    %56 = vector.shape_cast %55 : vector<16xf32> to vector<16x1xf32>
    %57 = vector.broadcast %56 : vector<16x1xf32> to vector<16x16xf32>
    %58 = arith.subf %54, %57 : vector<16x16xf32>
    %59 = math.exp %58 : vector<16x16xf32>
    %cst_24 = arith.constant dense<0.000000e+00> : vector<16xf32>
    %60 = vector.multi_reduction <add>, %59, %cst_24 [1] : vector<16x16xf32> to vector<16xf32>
    %61 = vector.shape_cast %60 : vector<16xf32> to vector<16x1xf32>
    %62 = tpu.reciprocal %61 {approx = true} : vector<16x1xf32> -> vector<16x1xf32>
    %63 = vector.broadcast %62 : vector<16x1xf32> to vector<16x16xf32>
    %64 = arith.mulf %59, %63 : vector<16x16xf32>
    %cst_25 = arith.constant dense<0.000000e+00> : vector<16x8xf32>
    %65 = tpu.matmul %64, %49, %cst_25 {dimension_numbers = #tpu.dot_dimension_numbers<[1], [0], [0], [1], [0, 0, 1, 1], [], []>} : vector<16x16xf32>, vector<16x8xf32>, vector<16x8xf32> -> vector<16x8xf32>
    %66 = vector.extract_strided_slice %5 {offsets = [0, 24], sizes = [16, 8], strides = [1, 1]} : vector<16x96xf32> to vector<16x8xf32>
    %67 = vector.extract_strided_slice %5 {offsets = [0, 56], sizes = [16, 8], strides = [1, 1]} : vector<16x96xf32> to vector<16x8xf32>
    %68 = vector.extract_strided_slice %5 {offsets = [0, 88], sizes = [16, 8], strides = [1, 1]} : vector<16x96xf32> to vector<16x8xf32>
    %cst_26 = arith.constant dense<0.000000e+00> : vector<16x16xf32>
    %69 = tpu.matmul %66, %67, %cst_26 {dimension_numbers = #tpu.dot_dimension_numbers<[1], [1], [0], [0], [0, 0, 1, 0], [], []>} : vector<16x8xf32>, vector<16x8xf32>, vector<16x16xf32> -> vector<16x16xf32>
    %cst_27 = arith.constant 0.176776692 : f32
    %70 = vector.broadcast %cst_27 : f32 to vector<16x16xf32>
    %71 = arith.mulf %69, %70 : vector<16x16xf32>
    %cst_28 = arith.constant -1.000000e+30 : f32
    %72 = vector.broadcast %cst_28 : f32 to vector<16x16xf32>
    %73 = arith.select %8, %71, %72 : vector<16x16xi1>, vector<16x16xf32>
    %cst_29 = arith.constant dense<0xFF800000> : vector<16xf32>
    %74 = vector.multi_reduction <maximumf>, %73, %cst_29 [1] : vector<16x16xf32> to vector<16xf32>
    %75 = vector.shape_cast %74 : vector<16xf32> to vector<16x1xf32>
    %76 = vector.broadcast %75 : vector<16x1xf32> to vector<16x16xf32>
    %77 = arith.subf %73, %76 : vector<16x16xf32>
    %78 = math.exp %77 : vector<16x16xf32>
    %cst_30 = arith.constant dense<0.000000e+00> : vector<16xf32>
    %79 = vector.multi_reduction <add>, %78, %cst_30 [1] : vector<16x16xf32> to vector<16xf32>
    %80 = vector.shape_cast %79 : vector<16xf32> to vector<16x1xf32>
    %81 = tpu.reciprocal %80 {approx = true} : vector<16x1xf32> -> vector<16x1xf32>
    %82 = vector.broadcast %81 : vector<16x1xf32> to vector<16x16xf32>
    %83 = arith.mulf %78, %82 : vector<16x16xf32>
    %cst_31 = arith.constant dense<0.000000e+00> : vector<16x8xf32>
    %84 = tpu.matmul %83, %68, %cst_31 {dimension_numbers = #tpu.dot_dimension_numbers<[1], [0], [0], [1], [0, 0, 1, 1], [], []>} : vector<16x16xf32>, vector<16x8xf32>, vector<16x8xf32> -> vector<16x8xf32>
    %85 = tpu.concatenate %27, %46, %65, %84 in 1 : vector<16x8xf32>, vector<16x8xf32>, vector<16x8xf32>, vector<16x8xf32> -> vector<16x32xf32>
    %cst_32 = arith.constant dense<0.000000e+00> : vector<16x32xf32>
    %86 = tpu.matmul %85, %3, %cst_32 {dimension_numbers = #tpu.dot_dimension_numbers<[1], [0], [0], [1], [0, 0, 1, 1], [], []>} : vector<16x32xf32>, vector<32x32xf32>, vector<16x32xf32> -> vector<16x32xf32>
    %87 = vector.broadcast %4 : vector<1x32xf32> to vector<16x32xf32>
    %88 = arith.addf %86, %87 : vector<16x32xf32>
    %c0_33 = arith.constant 0 : index
    %c0_34 = arith.constant 0 : index
    %c0_35 = arith.constant 0 : index
    %89 = vector.load %arg5[%c0_33, %c0_34, %c0_35] : memref<1x16x32xf32, #tpu.memory_space<vmem>>, vector<1x16x32xf32>
    %90 = vector.shape_cast %89 : vector<1x16x32xf32> to vector<16x32xf32>
    %91 = vector.shape_cast %88 : vector<16x32xf32> to vector<1x16x32xf32>
    tpu.vector_store %arg5[%c0_33, %c0_34, %c0_35], %91 {strides = array<i32>} : memref<1x16x32xf32, #tpu.memory_space<vmem>>, vector<1x16x32xf32>,
    return
  }
  func.func @transform_0(%arg0: i32) -> (i32, i32, i32) {
    %c0_i32 = arith.constant 0 : i32
    %c0_i32_0 = arith.constant 0 : i32
    %c0_i32_1 = arith.constant 0 : i32
    return %arg0, %c0_i32, %c0_i32_0 : i32, i32, i32
  }
  func.func @transform_1(%arg0: i32) -> (i32, i32) {
    %c0_i32 = arith.constant 0 : i32
    %c0_i32_0 = arith.constant 0 : i32
    %c0_i32_1 = arith.constant 0 : i32
    return %c0_i32, %c0_i32_0 : i32, i32
  }
  func.func @transform_2(%arg0: i32) -> (i32, i32) {
    %c0_i32 = arith.constant 0 : i32
    %c0_i32_0 = arith.constant 0 : i32
    %c0_i32_1 = arith.constant 0 : i32
    return %c0_i32, %c0_i32_0 : i32, i32
  }
  func.func @transform_3(%arg0: i32) -> (i32, i32) {
    %c0_i32 = arith.constant 0 : i32
    %c0_i32_0 = arith.constant 0 : i32
    %c0_i32_1 = arith.constant 0 : i32
    return %c0_i32, %c0_i32_0 : i32, i32
  }
  func.func @transform_4(%arg0: i32) -> (i32, i32, i32) {
    %c0_i32 = arith.constant 0 : i32
    %c0_i32_0 = arith.constant 0 : i32
    %c0_i32_1 = arith.constant 0 : i32
    return %arg0, %c0_i32, %c0_i32_0 : i32, i32, i32
  }
}

</mosaic_0001>

<bundles_post_ra>
// kernel: tpu_custom_call.1
= control target key start
LH: loop header
LB: loop body
LE: loop exit
PB: predicated region body
PF: predicated region fallthrough
CT: control target
= control target key end

     0   :  { %9 = vsyncpa [#allocation3], 0  ;;  %s1538_s0 = inlined_call_operand.hbm [shape: f32[2,16,32], index: 0, kind: input, shape index: {}]   ;;  %s1539_s1 = inlined_call_operand.hbm [shape: f32[32,96], index: 1, kind: input, shape index: {}]   ;;  %s1540_s2 = inlined_call_operand.hbm [shape: f32[32,32], index: 2, kind: input, shape index: {}]   ;;  %s1541_s3 = inlined_call_operand.vmem [shape: f32[1,32], index: 3, kind: input, shape index: {}]   ;;  %s1542_s4 = inlined_call_operand.hbm [shape: f32[2,16,32], index: 4, kind: output, shape index: {}]  }
   0x1   :  { %11 = vsyncpa [#allocation3 + $0x1], 0 }
   0x2   :  { %12 = vsyncpa [#allocation6], 0 }
   0x3   :  { %13 = vsyncpa [#allocation4], 0 }
   0x4   :  { %15 = vsyncpa [#allocation4 + $0x1], 0  ;;  %s1269_s15 = smov 0   ;;  %s1271_s16 = smov 0  }
   0x5   :  { %s1273_s17 = smov 0   ;;  %s1275_s18 = smov 0  }
   0x6 LB: > { %s1290_s19 = sadd.s32 4294967295, %s1223_s18   ;;  %s872_s20 = sadd.s32 4294967294, %s1223_s18   ;;  %s1223_s18 = sphi %s1275_s18, %s1552_s18   ;;  %s1219_s17 = sphi %s1273_s17, %s1551_s17   ;;  %s1215_s16 = sphi %s1271_s16, %s1550_s16   ;;  %s1211_s15 = sphi %s1269_s15, %s1549_s15  }
   0x7   : > { %p41_p0 = scmp.ne.s32.totalorder %s1215_s16, %s1211_s15  ;;  %p42_p1 = scmp.eq.s32.totalorder %s1290_s19, 0 }
   0x8   : > { %p128_p2 = scmp.eq.s32.totalorder %s1290_s19, 1  ;;  %p134_p3 = scmp.eq.s32.totalorder %s872_s20, 1 }
   0x9   : > { %p1299_p4 = por %p42_p1, %p41_p0  ;;  %p873_p5 = scmp.ge.s32.totalorder %s1223_s18, 1 }
   0xa   : > { %p1304_p6 = por %p134_p3, %p41_p0  ;;  %p141_p7 = scmp.lt.s32.totalorder %s1223_s18, 3 }
   0xb   : > { %s152_s25 = sshll.u32 %s1539_s1, 4  ;;  %s1225_s27 = smov [#allocation5]   ;;  %s153_s25 = int_to_ptr.hbm [resolvable:$true] %s152_s25 }
   0xc   : > { %p1312_p8 = pnand %p873_p5, %p141_p7  ;;  %s154_s28 = sshll.u32 %s1225_s27, 4  ;;  %s155_s28 = int_to_ptr.vmem [resolvable:$true] %s154_s28 }
   0xd   : > { %s166_s5 = sshll.u32 %s1540_s2, 4  ;;  %s1226_s6 = smov 128   ;;  %s167_s5 = int_to_ptr.hbm [resolvable:$true] %s166_s5 }
   0xe   : > { %p938_p9 = pneg %p1312_p8  ;;  %s1227_s7 = smov 8  }
   0xf   : > { %s1228_s8 = smov [#allocation7]   ;;  %s1331_s10 = sadd.s32 1, %s1223_s18  }
  0x10   : > { %p939_p10 = pnand %p938_p9, %p42_p1  ;;  %s168_s9 = sshll.u32 %s1228_s8, 4  ;;  %s169_s9 = int_to_ptr.vmem [resolvable:$true] %s168_s9 }
  0x11   : > { %s28_s11 = sadd.s32 1, %s1219_s17  ;;  %s25_s12 = ssub.s32 %s1223_s18, %s1331_s10 }
  0x12   : > { %941 = dma.hbm_to_vmem [thread:$0]  (!%p939_p10), %s153_s25, 512, %s155_s28, [#allocation6], %s1226_s6, %s1226_s6, %s1227_s7  }
  0x13   : > { %944 = dma.hbm_to_vmem [thread:$0]  (!%p939_p10), %s167_s5, 512, %s169_s9, [#allocation6], %s1226_s6, %s1226_s6, %s1227_s7  }
  0x14   : > { %p35_p12 = scmp.ne.s32.totalorder %s1219_s17, %s1215_s16  ;;  %p26_p13 = scmp.eq.s32.totalorder %s25_s12, 0 }
  0x15   : > { %p36_p0 = scmp.eq.s32.totalorder %s1223_s18, 0  ;;  %p955_p5 = scmp.lt.s32.totalorder %s1223_s18, 2 }
  0x16   : > { %p1341_p3 = por %p128_p2, %p35_p12  ;;  %s185_s20 = sand.u32 1, %s1219_s17  }
  0x17   : > { %s1347_s14 = scalar_select %p26_p13, %s1219_s17, %s28_s11  }
  0x18   : > { %p37_p7 = por %p36_p0, %p35_p12  ;;  %s877_s23 = sshll.u32 %s185_s20, 4 }
  0x19   : > { %s918_s24 = sshll.u32 %s1223_s18, 4  ;;  %s189_s29 = scalar_lea.vmem [#allocation2], %s877_s23 }
  0x1a   : > { %s194_s28 = scalar_lea.hbm %s1538_s0, %s918_s24  ;;  %s197_s30 = sshll.u32 %s189_s29, 4  ;;  %s198_s30 = int_to_ptr.vmem [resolvable:$true] %s197_s30 }
  0x1b   : > { %s195_s5 = sshll.u32 %s194_s28, 4  ;;  %p1354_p2 = pnand %p955_p5, %p37_p7  ;;  %s196_s5 = int_to_ptr.hbm [resolvable:$true] %s195_s5 }
  0x1c   : > { %s186_s9 = scalar_lea.sflag [#allocation3], %s185_s20  ;;  %s1123_s11 = sshra.s32 %s196_s5, 4  ;;  %s1124_s11 = int_to_ptr.hbm [resolvable:$true] %s1123_s11 }
  0x1d   : > { %s1125_s12 = scalar_lea.hbm %s1124_s11, 16  ;;  %p1127_p10 = pneg %p1354_p2 }
  0x1e   : > { %p1126_p9 = scmp.ne.s32.totalorder %s1124_s11, %s1125_s12  ;;  %s1130_s25 = scalar_lea.hbm %s1538_s0, 32 }
  0x1f   : > { %p1131_p0 = scmp.lt.s32.totalorder %s1124_s11, %s1538_s0  ;;  %p1132_p5 = scmp.lt.s32.totalorder %s1130_s25, %s1125_s12 }
  0x20   : > { %p1128_p12 = pnand %p1127_p10, %p1126_p9 }
  0x21   : > { %p1133_p7 = por %p1132_p5, %p1131_p0 }
  0x22   : > { %p1129_p13 = pneg %p1128_p12 }
  0x24   : > { %p1134_p11 = pnand %p1133_p7, %p1129_p13 }
  0x26   : > { %1137 = shalt.err (!%p1134_p11)
}
  0x27   : > { %948 = dma.hbm_to_vmem [thread:$0]  (!%p1354_p2), %s196_s5, 256, %s198_s30, %s186_s9, %s1226_s6, %s1226_s6, %s1227_s7  }
  0x28   : > { %209 = sbr.rel (%p1312_p8) target bundleno = 1512 (0x5e8), region = 36  ;;  %s1374_s20 = sand.u32 (!%p1312_p8), 1, %s1215_s16  }
  0x29   : > { %s881_s29 = sshll.u32 (!%p1312_p8), %s1374_s20, 4  ;;  %s212_s11 = scalar_lea.sflag (!%p1312_p8), [#allocation3], %s1374_s20 }
  0x2a   : > { %s215_s12 = scalar_lea.vmem (!%p1312_p8), [#allocation2], %s881_s29 }
  0x2d   : > { %1198 = dma.done.wait (%p1299_p4), %s212_s11, 256  }
  0x2e   : > { %1200 = vsyncadd (%p1299_p4), %s212_s11, 4294967040 }
  0x2f   : > { %1202 = dma.done.wait (%p42_p1), [#allocation6], 1024  }
  0x30   : > { %1204 = vsyncadd (%p42_p1), [#allocation6], 4294966272  ;;  %v256_v0 = vld [vmem:[#allocation5 + $0x18] sm:$0xff]  ;;  %v255_v1 = vld [vmem:[#allocation5 + $0x10] sm:$0xff]  ;;  %vm262_vm0 = vcmask 261120   ;;  %s1229_s21 = smov 96   ;;  %v292_v22 = vlaneseq }
  0x31   : > { %281 = vmatpush.msra.mxu0 %v256_v0  ;;  %920 = vmatpush.msra.mxu1 %v256_v0  ;;  %v254_v2 = vld [vmem:[#allocation5 + $0x8] sm:$0xff]  ;;  %v253_v3 = vld [vmem:[#allocation5] sm:$0xff]  ;;  %s1230_s26 = smov 64   ;;  %s1231_s6 = smov 88   ;;  %vm305_vm1 = vcmask 64512   ;;  %vm341_vm3 = vcmask 130048  }
  0x32   : > { %v251_v4 = vld [vmem:[%s215_s12] sm:$0xff]  ;;  %v252_v5 = vld [vmem:[%s215_s12 + $0x8] sm:$0xff]  ;;  %s1232_s7 = smov 120   ;;  %s1233_s30 = smov 72   ;;  %v1412_v23 = vshrl.u32 %v292_v22, 7  ;;  %v1414_v24 = vand.u32 127, %v292_v22 }
  0x33   : > { %282 = vmatpush.msra.mxu0 %v255_v1  ;;  %921 = vmatpush.msra.mxu1 %v255_v1  ;;  %s1234_s5 = smov 104   ;;  %s1235_s8 = smov 80   ;;  %vm727_vm5 = vcmask 195584  }
  0x34   : > { %s1236_s9 = smov 112   ;;  %vm297_vm2 = vcmp.le.s32.totalorder %v1414_v24, %v1412_v23  ;;  %v1423_v29 = vadd.s32 8, %v1412_v23  ;;  %s1237_s24 = smov 56  }
  0x35   : > { %283 = vmatpush.msra.mxu0 %v254_v2  ;;  %922 = vmatpush.msra.mxu1 %v254_v2  ;;  %s1238_s23 = smov 48   ;;  %s1239_s25 = smov 40  }
  0x36   : > { %vm298_vm4 = vcmp.le.s32.totalorder %v1414_v24, %v1423_v29  ;;  %s1240_s27 = smov 8   ;;  %s1241_s28 = smov 16  }
  0x37   : > { %284 = vmatpush.msra.mxu0 %v253_v3  ;;  %923 = vmatpush.msra.mxu1 %v253_v3  ;;  %s1242_s11 = smov 24  }
  0x38   : > { %885 = vmatmul.msk.f32.vlgmr.msra.gmra.mxu0 %vm262_vm0, %v251_v4  ;;  %886 = vmatmul.msk.f32.vlgmr.msra.gmra.mxu1 %vm262_vm0, %v252_v5 }
  0xb5   : > { %v1390_v6 = vpop.f32.mrf.mxu0  ;;  %v289_v7 = vpop.f32.mrf.mxu1 }
  0xb6   : > { %303 = vrot.lane.b32.xlu0 %v289_v7, %s1229_s21  ;;  %v1393_v8 = vpack.i.bf16 %v1390_v6, %v289_v7 }
  0xb8   : > { %1011 = vrot.lane.b32.xlu2 %v1393_v8, %s1230_s26  ;;  %s919_s26 = sshll.u32 %s1290_s19, 4 }
  0xbe   : > { %301 = vrot.lane.b32.xlu0 %v1390_v6, %s1229_s21 }
  0xc0   : > { %405 = vrot.lane.b32.xlu2 %v289_v7, %s1231_s6 }
  0xc6   : > { %403 = vrot.lane.b32.xlu0 %v1390_v6, %s1231_s6  ;;  %s250_s6 = scalar_lea.vmem [#allocation8], %s881_s29 }
  0xc8   : > { %401 = vrot.lane.b32.xlu2 %v289_v7, %s1232_s7 }
  0xce   : > { %605 = vrot.lane.b32.xlu0 %v289_v7, %s1233_s30 }
  0xd0   : > { %603 = vrot.lane.b32.xlu2 %v1390_v6, %s1233_s30 }
  0xd6   : > { %599 = vrot.lane.b32.xlu0 %v1390_v6, %s1234_s5 }
  0xd8   : > { %505 = vrot.lane.b32.xlu2 %v289_v7, %s1235_s8 }
  0xde   : > { %503 = vrot.lane.b32.xlu0 %v1390_v6, %s1235_s8  ;;  %s777_s8 = sshll.u32 %s250_s6, 4  ;;  %s778_s8 = int_to_ptr.vmem [resolvable:$true] %s777_s8 }
  0xe0   : > { %601 = vrot.lane.b32.xlu2 %v289_v7, %s1234_s5  ;;  %s776_s5 = scalar_lea.hbm %s1542_s4, %s919_s26 }
  0xe6   : > { %501 = vrot.lane.b32.xlu0 %v289_v7, %s1236_s9 }
 0x112   : > { %v1012_v9 = vpop.permute.xlu2 %1011 }
 0x113   : > { %v1013_v10 = vunpack.i.l.bf16 %v1012_v9  ;;  %v1014_v11 = vunpack.i.h.bf16 %v1012_v9 }
 0x115   : > { %390 = vmatpush.msra.mxu2 %v1013_v10  ;;  %924 = vmatpush.msra.mxu3 %v1013_v10 }
 0x117   : > { %391 = vmatpush.msra.mxu2 %v1014_v11  ;;  %925 = vmatpush.msra.mxu3 %v1014_v11 }
 0x11a   : > { %v406_v12 = vpop.permute.xlu2 %405 }
 0x11b   : > { %893 = vmatpush.xpose.msk.msrb.mxu3 %vm305_vm1, %v406_v12 }
 0x122   : > { %v402_v13 = vpop.permute.xlu2 %401 }
 0x128   : > { %v304_v14 = vpop.permute.xlu0 %303 }
 0x129   : > { %887 = vmatpush.xpose.msk.msrb.mxu1 %vm305_vm1, %v304_v14 }
 0x12a   : > { %v604_v15 = vpop.permute.xlu2 %603 }
 0x130   : > { %v302_v16 = vpop.permute.xlu0 %301 }
 0x131   : > { %888 = vmatpush.xpose.msk.msrb.mxu1 %vm305_vm1, %v302_v16 }
 0x132   : > { %v506_v17 = vpop.permute.xlu2 %505 }
 0x133   : > { %899 = vmatpush.xpose.msk.msrb.mxu0 %vm305_vm1, %v506_v17 }
 0x134   : > { %889 = vmatmul.msk.f32.vlgmr.msrb.gmra.mxu1 %vm305_vm1, %v1390_v6 }
 0x138   : > { %v404_v18 = vpop.permute.xlu0 %403 }
 0x139   : > { %894 = vmatpush.xpose.msk.msrb.mxu3 %vm305_vm1, %v404_v18 }
 0x13a   : > { %v602_v45 = vpop.permute.xlu2 %601 }
 0x13c   : > { %890 = vmatmul.msk.f32.gmra.mxu1 %vm305_vm1, %v289_v7 }
 0x140   : > { %v606_v19 = vpop.permute.xlu0 %605 }
 0x148   : > { %v600_v20 = vpop.permute.xlu0 %599 }
 0x150   : > { %v504_v21 = vpop.permute.xlu0 %503 }
 0x151   : > { %900 = vmatpush.xpose.msk.msrb.mxu0 %vm305_vm1, %v504_v21 }
 0x158   : > { %v502_v44 = vpop.permute.xlu0 %501 }
 0x1b1   : > { %v331_v25 = vpop.f32.mrf.mxu1 }
 0x1b2   : > { %v337_v26 = vmul.f32 0.17677669, %v331_v25 }
 0x1b4   : > { %v339_v27 = vsel %vm297_vm2, %v337_v26, -1e+30 }
 0x1b5   : > { %v342_v28 = vsel %vm341_vm3, %v339_v27, -inf }
 0x1b6   : > { %343 = vmax.xlane.f32.xlu2 %v342_v28 }
 0x1b9   : > { %v334_v30 = vpop.f32.mrf.mxu1 }
 0x1ba   : > { %v338_v31 = vmul.f32 0.17677669, %v334_v30 }
 0x1bc   : > { %v340_v32 = vsel %vm298_vm4, %v338_v31, -1e+30 }
 0x1bd   : > { %v345_v33 = vsel %vm341_vm3, %v340_v32, -inf }
 0x1be   : > { %346 = vmax.xlane.f32.xlu1 %v345_v33 }
 0x229   : > { %v344_v47 = vpop.xlane.xlu2 %343 }
 0x22a   : > { %v348_v51 = vsub.f32 %v339_v27, %v344_v47 }
 0x22c   : > { %v350_v55 = vmul.f32 1.442695, %v348_v51 }
 0x231   : > { %v347_v34 = vpop.xlane.xlu1 %346 }
 0x232   : > { %v349_v35 = vsub.f32 %v340_v32, %v347_v34 }
 0x234   : > { %v352_v36 = vmul.f32 1.442695, %v349_v35 }
 0x236   : > { %1031 = vpow2.f32 %v352_v36 }
 0x23c   : > { %v1032_v37 = vpop.eup %1031 }
 0x23d   : > { %v357_v38 = vsel %vm341_vm3, %v1032_v37, 0.0 }
 0x23e   : > { %358 = vadd.xlane.f32.xlu1 %v357_v38 }
 0x257   : > { %399 = vrot.lane.b32.xlu1 %v1390_v6, %s1232_s7 }
 0x25f   : > { %499 = vrot.lane.b32.xlu1 %v1390_v6, %s1236_s9  ;;  %s779_s9 = sshll.u32 %s776_s5, 4  ;;  %s780_s9 = int_to_ptr.hbm [resolvable:$true] %s779_s9 }
 0x2b1   : > { %v359_v39 = vpop.xlane.xlu1 %358 }
 0x2b2   : > { %1033 = vrcp.f32 %v359_v39 }
 0x2b3   : > { %1035 = vpow2.f32 %v350_v55 }
 0x2b8   : > { %v1034_v40 = vpop.eup %1033 }
 0x2b9   : > { %v363_v41 = vmul.f32 %v1034_v40, %v1032_v37  ;;  %v1036_v1 = vpop.eup %1035 }
 0x2ba   : > { %v354_v6 = vsel %vm341_vm3, %v1036_v1, 0.0 }
 0x2bb   : > { %892 = vmatmul.msk.f32.vlgmr.msra.gmra.mxu3 %vm341_vm3, %v363_v41 }
 0x2bc   : > { %905 = vmatpush.xpose.msk.msra.mxu3 %vm305_vm1, %v606_v19 }
 0x2c0   : > { %906 = vmatpush.xpose.msk.msra.mxu3 %vm305_vm1, %v604_v15 }
 0x2c9   : > { %v400_v42 = vpop.permute.xlu1 %399 }
 0x2ca   : > { %895 = vmatmul.msk.f32.vlgmr.msrb.gmra.mxu3 %vm305_vm1, %v400_v42 }
 0x2d1   : > { %v500_v43 = vpop.permute.xlu1 %499 }
 0x2d2   : > { %896 = vmatmul.msk.f32.gmra.mxu3 %vm305_vm1, %v402_v13  ;;  %901 = vmatmul.msk.f32.vlgmr.msrb.gmra.mxu0 %vm305_vm1, %v500_v43 }
 0x2da   : > { %902 = vmatmul.msk.f32.gmra.mxu0 %vm305_vm1, %v502_v44  ;;  %907 = vmatmul.msk.f32.vlgmr.msra.gmra.mxu3 %vm305_vm1, %v600_v20 }
 0x2e2   : > { %908 = vmatmul.msk.f32.gmra.mxu3 %vm305_vm1, %v602_v45 }
 0x33e   : > { %v1445_v46 = vpop.f32.mrf.mxu3 }
 0x34d   : > { %v432_v48 = vpop.f32.mrf.mxu3 }
 0x34e   : > { %v438_v49 = vmul.f32 0.17677669, %v432_v48 }
 0x34f   : > { %v532_v50 = vpop.f32.mrf.mxu0 }
 0x350   : > { %v440_v52 = vsel %vm297_vm2, %v438_v49, -1e+30  ;;  %v538_v54 = vmul.f32 0.17677669, %v532_v50 }
 0x351   : > { %v442_v53 = vsel %vm341_vm3, %v440_v52, -inf }
 0x352   : > { %443 = vmax.xlane.f32.xlu1 %v442_v53  ;;  %v540_v58 = vsel %vm297_vm2, %v538_v54, -1e+30 }
 0x353   : > { %v542_v62 = vsel %vm341_vm3, %v540_v58, -inf }
 0x355   : > { %v435_v56 = vpop.f32.mrf.mxu3 }
 0x356   : > { %v439_v57 = vmul.f32 0.17677669, %v435_v56 }
 0x357   : > { %v535_v59 = vpop.f32.mrf.mxu0 }
 0x358   : > { %v441_v60 = vsel %vm298_vm4, %v439_v57, -1e+30  ;;  %v539_v63 = vmul.f32 0.17677669, %v535_v59 }
 0x359   : > { %v445_v61 = vsel %vm341_vm3, %v441_v60, -inf }
 0x35a   : > { %446 = vmax.xlane.f32.xlu0 %v445_v61  ;;  %543 = vmax.xlane.f32.xlu1 %v542_v62  ;;  %v541_v3 = vsel %vm298_vm4, %v539_v63, -1e+30 }
 0x35b   : > { %v545_v7 = vsel %vm341_vm3, %v541_v3, -inf }
 0x35d   : > { %v632_v0 = vpop.f32.mrf.mxu3 }
 0x35e   : > { %v638_v2 = vmul.f32 0.17677669, %v632_v0 }
 0x360   : > { %v640_v4 = vsel %vm297_vm2, %v638_v2, -1e+30 }
 0x361   : > { %v642_v5 = vsel %vm341_vm3, %v640_v4, -inf }
 0x362   : > { %643 = vmax.xlane.f32.xlu2 %v642_v5  ;;  %355 = vadd.xlane.f32.xlu1 %v354_v6 }
 0x363   : > { %546 = vmax.xlane.f32.xlu0 %v545_v7 }
 0x365   : > { %v635_v9 = vpop.f32.mrf.mxu3 }
 0x366   : > { %v639_v10 = vmul.f32 0.17677669, %v635_v9 }
 0x368   : > { %v641_v11 = vsel %vm298_vm4, %v639_v10, -1e+30 }
 0x369   : > { %v645_v12 = vsel %vm341_vm3, %v641_v11, -inf }
 0x36a   : > { %646 = vmax.xlane.f32.xlu2 %v645_v12 }
 0x377   : > { %1016 = vrot.lane.b32.xlu0 %v1393_v8, %s1237_s24  ;;  %s765_s24 = scalar_lea.sflag [#allocation4], %s1374_s20 }
 0x37f   : > { %1026 = vrot.lane.b32.xlu0 %v1393_v8, %s1238_s23  ;;  %s1167_s23 = sshra.s32 %s780_s9, 4  ;;  %s1168_s23 = int_to_ptr.hbm [resolvable:$true] %s1167_s23 }
 0x380   : > { %s1169_s19 = scalar_lea.hbm %s1168_s23, 16  ;;  %p1174_p11 = scmp.lt.s32.totalorder %s1168_s23, %s1542_s4 }
 0x381   : > { %p1170_p1 = scmp.ne.s32.totalorder %s1168_s23, %s1169_s19 }
 0x383   : > { %p1171_p4 = pnand %p1170_p1, %p1341_p3 }
 0x385   : > { %p1172_p8 = pneg %p1171_p4 }
 0x3c5   : > { %v444_v13 = vpop.xlane.xlu1 %443 }
 0x3c6   : > { %v448_v14 = vsub.f32 %v440_v52, %v444_v13 }
 0x3c8   : > { %v450_v15 = vmul.f32 1.442695, %v448_v14 }
 0x3ca   : > { %1037 = vpow2.f32 %v450_v15 }
 0x3cd   : > { %v544_v16 = vpop.xlane.xlu1 %543  ;;  %v447_v17 = vpop.xlane.xlu0 %446 }
 0x3ce   : > { %v449_v18 = vsub.f32 %v441_v60, %v447_v17  ;;  %v548_v21 = vsub.f32 %v540_v58, %v544_v16  ;;  %v260_v17 = vld [vmem:[#allocation7 + $0x18] sm:$0xff] }
 0x3cf   : > { %751 = vmatpush.msra.mxu0 %v260_v17 }
 0x3d0   : > { %v1038_v19 = vpop.eup %1037  ;;  %v452_v20 = vmul.f32 1.442695, %v449_v18  ;;  %v550_v23 = vmul.f32 1.442695, %v548_v21  ;;  %v259_v18 = vld [vmem:[#allocation7 + $0x10] sm:$0xff] }
 0x3d1   : > { %v454_v22 = vsel %vm341_vm3, %v1038_v19, 0.0  ;;  %752 = vmatpush.msra.mxu0 %v259_v18 }
 0x3d2   : > { %455 = vadd.xlane.f32.xlu2 %v454_v22  ;;  %1039 = vpow2.f32 %v452_v20  ;;  %v257_v20 = vld [vmem:[#allocation7] sm:$0xff] }
 0x3d5   : > { %v644_v24 = vpop.xlane.xlu2 %643  ;;  %v356_v25 = vpop.xlane.xlu1 %355 }
 0x3d6   : > { %v648_v26 = vsub.f32 %v640_v4, %v644_v24  ;;  %1041 = vrcp.f32 %v356_v25  ;;  %v547_v33 = vpop.xlane.xlu0 %546 }
 0x3d7   : > { %1043 = vpow2.f32 %v550_v23  ;;  %v549_v38 = vsub.f32 %v541_v3, %v547_v33  ;;  %v1030_v33 = vld [vmem:[%s1541_s3] ss:$0 sm:$0xff] }
 0x3d8   : > { %v650_v27 = vmul.f32 1.442695, %v648_v26  ;;  %v1040_v28 = vpop.eup %1039 }
 0x3d9   : > { %v457_v29 = vsel %vm341_vm3, %v1040_v28, 0.0  ;;  %v552_v41 = vmul.f32 1.442695, %v549_v38 }
 0x3da   : > { %1045 = vpow2.f32 %v650_v27  ;;  %458 = vadd.xlane.f32.xlu1 %v457_v29 }
 0x3dc   : > { %v1042_v30 = vpop.eup %1041 }
 0x3dd   : > { %v647_v31 = vpop.xlane.xlu2 %646  ;;  %v362_v32 = vmul.f32 %v1042_v30, %v1036_v1  ;;  %v1044_v35 = vpop.eup %1043 }
 0x3de   : > { %v649_v34 = vsub.f32 %v641_v11, %v647_v31  ;;  %v554_v40 = vsel %vm341_vm3, %v1044_v35, 0.0 }
 0x3df   : > { %891 = vmatmul.msk.f32.vlgmr.msra.gmra.mxu2 %vm341_vm3, %v362_v32 }
 0x3e0   : > { %v1046_v36 = vpop.eup %1045  ;;  %v652_v37 = vmul.f32 1.442695, %v649_v34 }
 0x3e1   : > { %v654_v39 = vsel %vm341_vm3, %v1046_v36, 0.0 }
 0x3e2   : > { %1047 = vpow2.f32 %v652_v37  ;;  %655 = vadd.xlane.f32.xlu2 %v654_v39  ;;  %555 = vadd.xlane.f32.xlu1 %v554_v40 }
 0x3e3   : > { %1049 = vpow2.f32 %v552_v41 }
 0x3e8   : > { %v1048_v42 = vpop.eup %1047 }
 0x3e9   : > { %v1017_v43 = vpop.permute.xlu0 %1016  ;;  %v657_v44 = vsel %vm341_vm3, %v1048_v42, 0.0  ;;  %v1050_v48 = vpop.eup %1049 }
 0x3ea   : > { %v1018_v45 = vunpack.i.l.bf16 %v1017_v43  ;;  %658 = vadd.xlane.f32.xlu1 %v657_v44  ;;  %v1019_v47 = vunpack.i.h.bf16 %v1017_v43  ;;  %v557_v51 = vsel %vm341_vm3, %v1050_v48, 0.0 }
 0x3ec   : > { %490 = vmatpush.msrb.mxu2 %v1018_v45 }
 0x3ee   : > { %491 = vmatpush.msrb.mxu2 %v1019_v47 }
 0x3f1   : > { %v1027_v49 = vpop.permute.xlu0 %1026 }
 0x3f2   : > { %v1028_v50 = vunpack.i.l.bf16 %v1027_v49  ;;  %558 = vadd.xlane.f32.xlu1 %v557_v51  ;;  %v1029_v52 = vunpack.i.h.bf16 %v1027_v49 }
 0x3f4   : > { %590 = vmatpush.msra.mxu1 %v1028_v50 }
 0x3f6   : > { %591 = vmatpush.msra.mxu1 %v1029_v52 }
 0x3fa   : > { %1021 = vrot.lane.b32.xlu2 %v1393_v8, %s1239_s25 }
 0x445   : > { %v456_v53 = vpop.xlane.xlu2 %455 }
 0x446   : > { %1051 = vrcp.f32 %v456_v53 }
 0x44c   : > { %v1052_v54 = vpop.eup %1051 }
 0x44d   : > { %v462_v55 = vmul.f32 %v1052_v54, %v1038_v19  ;;  %v459_v56 = vpop.xlane.xlu1 %458  ;;  %v258_v19 = vld [vmem:[#allocation7 + $0x8] sm:$0xff] }
 0x44e   : > { %1053 = vrcp.f32 %v459_v56  ;;  %753 = vmatpush.msra.mxu0 %v258_v19 }
 0x44f   : > { %897 = vmatmul.msk.f32.vlgmr.msrb.gmra.mxu2 %vm341_vm3, %v462_v55 }
 0x450   : > { %754 = vmatpush.msra.mxu0 %v257_v20 }
 0x454   : > { %v1054_v57 = vpop.eup %1053 }
 0x455   : > { %v656_v58 = vpop.xlane.xlu2 %655  ;;  %v556_v59 = vpop.xlane.xlu1 %555  ;;  %v463_v60 = vmul.f32 %v1054_v57, %v1040_v28 }
 0x456   : > { %1055 = vrcp.f32 %v556_v59 }
 0x457   : > { %1057 = vrcp.f32 %v656_v58  ;;  %898 = vmatmul.msk.f32.gmra.mxu2 %vm341_vm3, %v463_v60 }
 0x45c   : > { %v1056_v61 = vpop.eup %1055 }
 0x45d   : > { %v1022_v62 = vpop.permute.xlu2 %1021  ;;  %v1058_v63 = vpop.eup %1057  ;;  %v562_v8 = vmul.f32 %v1056_v61, %v1044_v35 }
 0x45e   : > { %v1023_v0 = vunpack.i.l.bf16 %v1022_v62  ;;  %v659_v1 = vpop.xlane.xlu1 %658  ;;  %v1024_v2 = vunpack.i.h.bf16 %v1022_v62  ;;  %v662_v3 = vmul.f32 %v1058_v63, %v1046_v36 }
 0x45f   : > { %1059 = vrcp.f32 %v659_v1  ;;  %903 = vmatmul.msk.f32.vlgmr.msra.gmra.mxu1 %vm341_vm3, %v562_v8 }
 0x460   : > { %690 = vmatpush.msra.mxu2 %v1023_v0 }
 0x462   : > { %691 = vmatpush.msra.mxu2 %v1024_v2  ;;  %v393_v10 = vpop.f32.mrf.mxu2 }
 0x463   : > { %909 = vmatmul.msk.f32.vlgmr.msra.gmra.mxu2 %vm341_vm3, %v662_v3 }
 0x465   : > { %v1060_v4 = vpop.eup %1059 }
 0x466   : > { %v559_v5 = vpop.xlane.xlu1 %558  ;;  %v663_v6 = vmul.f32 %v1060_v4, %v1048_v42 }
 0x467   : > { %1061 = vrcp.f32 %v559_v5 }
 0x46b   : > { %910 = vmatmul.msk.f32.gmra.mxu2 %vm341_vm3, %v663_v6 }
 0x46d   : > { %v1062_v7 = vpop.eup %1061 }
 0x46e   : > { %v563_v9 = vmul.f32 %v1062_v7, %v1050_v48 }
 0x470   : > { %904 = vmatmul.msk.f32.gmra.mxu1 %vm341_vm3, %v563_v9 }
 0x4d2   : > { %v493_v11 = vpop.f32.mrf.mxu2 }
 0x4d3   : > { %701 = vrot.lane.b32.xlu0 %v493_v11, %s1240_s27 }
 0x4da   : > { %v496_v12 = vpop.f32.mrf.mxu2 }
 0x4db   : > { %703 = vrot.lane.b32.xlu2 %v496_v12, %s1240_s27 }
 0x4dc   : > { %v593_v13 = vpop.f32.mrf.mxu1 }
 0x4dd   : > { %709 = vrot.lane.b32.xlu1 %v593_v13, %s1241_s28 }
 0x4e6   : > { %v693_v14 = vpop.f32.mrf.mxu2 }
 0x4e7   : > { %717 = vrot.lane.b32.xlu0 %v693_v14, %s1242_s11 }
 0x4ed   : > { %v596_v15 = vpop.f32.mrf.mxu1 }
 0x4ee   : > { %v696_v16 = vpop.f32.mrf.mxu2 }
 0x4ef   : > { %711 = vrot.lane.b32.xlu0 %v596_v15, %s1241_s28  ;;  %719 = vrot.lane.b32.xlu2 %v696_v16, %s1242_s11  ;;  %s1173_s28 = scalar_lea.hbm %s1542_s4, 32 }
 0x4f0   : > { %p1175_p2 = scmp.lt.s32.totalorder %s1173_s28, %s1169_s19 }
 0x4f2   : > { %p1176_p9 = por %p1175_p2, %p1174_p11 }
 0x4f4   : > { %p1177_p10 = pnand %p1176_p9, %p1172_p8 }
 0x535   : > { %v704_v26 = vpop.permute.xlu2 %703 }
 0x536   : > { %v724_v28 = vsel %vm305_vm1, %v1445_v46, %v704_v26 }
 0x545   : > { %v702_v21 = vpop.permute.xlu0 %701 }
 0x546   : > { %v723_v23 = vsel %vm305_vm1, %v393_v10, %v702_v21 }
 0x549   : > { %v720_v30 = vpop.permute.xlu2 %719 }
 0x54f   : > { %v710_v22 = vpop.permute.xlu1 %709 }
 0x550   : > { %v725_v24 = vsel %vm341_vm3, %v723_v23, %v710_v22 }
 0x559   : > { %v718_v25 = vpop.permute.xlu0 %717 }
 0x55a   : > { %v728_v27 = vsel %vm727_vm5, %v725_v24, %v718_v25 }
 0x55b   : > { %911 = vmatmul.msk.f32.vlgmr.msra.gmra.mxu0 %vm262_vm0, %v728_v27 }
 0x561   : > { %v712_v29 = vpop.permute.xlu0 %711 }
 0x562   : > { %v726_v31 = vsel %vm341_vm3, %v724_v28, %v712_v29 }
 0x563   : > { %v729_v32 = vsel %vm727_vm5, %v726_v31, %v720_v30 }
 0x564   : > { %912 = vmatmul.msk.f32.gmra.mxu0 %vm262_vm0, %v729_v32 }
 0x5d8   : > { %v756_v34 = vpop.f32.mrf.mxu0 }
 0x5d9   : > { %v757_v35 = vadd.f32 %v1030_v33, %v756_v34 }
 0x5db   : > { %762 = vst.msk [vmem:[%s250_s6] sm:$0xff] %vm262_vm0, %v757_v35 }
 0x5e1   : > { %v759_v46 = vpop.f32.mrf.mxu0 }
 0x5e2   : > { %v760_v36 = vadd.f32 %v1030_v33, %v759_v46 }
 0x5e4   : > { %763 = vst.msk [vmem:[%s250_s6 + $0x8] sm:$0xff] %vm262_vm0, %v760_v36 }
 0x5e5   : > { %1180 = shalt.err (!%p1177_p10)
}
 0x5e6   : > { %s1243_s20 = smov 128  }
 0x5e7   : > { %936 = dma.vmem_to_hbm [thread:$0]  (%p1341_p3), %s778_s8, 256, %s780_s9, %s765_s24, %s1243_s20, %s1243_s20, %s1240_s27  }
 0x5e8 PF: > { %s794_s21 = sand.u32 1, %s1211_s15   ;;  %p1548_p12 = scmp.ge.s32.totalorder %s1223_s18, 2 }
 0x5e9   : > { %s795_s26 = scalar_lea.sflag [#allocation4], %s794_s21 }
 0x5ea   : > { %p950_p13 = pnand %p1548_p12, %p1304_p6 }
 0x5ec   : > { %p951_p0 = pneg %p950_p13 }
 0x5ee   : > { %1206 = dma.done.wait (%p951_p0), %s795_s26, 256  }
 0x5ef   : > { %1208 = vsyncadd (%p951_p0), %s795_s26, 4294967040  ;;  %p18_p5 = scmp.ge.s32.totalorder %s1331_s10, 4   ;;  %s1549_s15 = smov %s1215_s16 }
 0x5f0   : > { %s1550_s16 = smov %s1219_s17  ;;  %s1551_s17 = smov %s1347_s14 }
 0x5f1   : > { %s1552_s18 = smov %s1331_s10  ;;  %20 = sbr.rel (!%p18_p5) target bundleno = 6 (0x6), region = 89 }
 0x5f6   :  { %801 = vsyncpa [#allocation3], 1 }
 0x5f7   :  { %803 = vsyncpa [#allocation3 + $0x1], 1 }
 0x5f8   :  { %804 = vsyncpa [#allocation6], 1 }
 0x5f9   :  { %805 = vsyncpa [#allocation4], 1 }
 0x5fa   :  { %807 = vsyncpa [#allocation4 + $0x1], 1 }

</bundles_post_ra>
